<compile_context>
chip_gen: v5e
topology: v5e:2x2
jax: 0.10.0
libtpu: 0.0.40
codegen_flags: <defaults>
</compile_context>

<pallas_src>
import functools

import jax
import jax.numpy as jnp
from jax.experimental import pallas as pl
from jax.experimental.pallas import tpu as pltpu


def _ceil_div(a, b):
    return -(-a // b)


def _shift_rows(a, s):
    """y[p] = a[p + s] if 0 <= p + s < rows(a) else 0   (s is a static int)."""
    if s == 0:
        return a
    n = a.shape[0]
    z = jnp.zeros((abs(s), a.shape[1]), a.dtype)
    if s > 0:
        return jnp.concatenate([a[s:, :], z], axis=0)
    return jnp.concatenate([z, a[:n + s, :]], axis=0)


def _res_block_kernel(x_ref, w1_ref, b1_ref, w2_ref, bsum_ref, wa_ref, o_ref,
                      *, H, W, Cin, Cout, pool, c1_im2col, c2_im2col):
    HW = H * W

    # ---- load input; fused 2x2 max-pool in bf16 (max is exact in any dtype;
    #      ceil_mode handled by a -inf pad in the wrapper for odd H/W) --------
    if pool:
        xall = x_ref[0]                                    # (H, 2, W, 2*Cin)
        xh = jnp.maximum(xall[:, 0], xall[:, 1])           # rows 2h vs 2h+1
        x3 = jnp.maximum(xh[:, :, :Cin], xh[:, :, Cin:])   # cols 2k vs 2k+1
    else:
        x3 = x_ref[0]                                      # (H, W, Cin) bf16

    x_flat = x3.reshape(HW, Cin)                           # center column, bf16

    def conv3x3(a3, C, w_ref, im2col):
        # Column taps fused along K: [a(j-1) | a(j) | a(j+1)] -> (HW, 3C) bf16,
        # built ONCE; row taps are +-W shifts of the flat array (zero fill).
        z = jnp.zeros((H, 1, C), a3.dtype)
        left = jnp.concatenate([z, a3[:, :W - 1, :]], axis=1)      # col j-1
        right = jnp.concatenate([a3[:, 1:, :], z], axis=1)         # col j+1
        cat = jnp.concatenate([left, a3, right], axis=2).reshape(HW, 3 * C)
        up = _shift_rows(cat, -W)      # kernel row kh=0  (dy = -1)
        dn = _shift_rows(cat, +W)      # kernel row kh=2  (dy = +1)
        if im2col:
            # Single big-K dot: MXU accumulates internally, no VPU adds.
            im = jnp.concatenate([up, cat, dn], axis=1)            # (HW, 9C)
            return jnp.dot(im, w_ref[...], preferred_element_type=jnp.float32)
        # 3 fused dots (K = 3C), accumulated in local values (no VMEM sweeps).
        acc = jnp.dot(up, w_ref[0], preferred_element_type=jnp.float32)
        acc = acc + jnp.dot(cat, w_ref[1], preferred_element_type=jnp.float32)
        acc = acc + jnp.dot(dn, w_ref[2], preferred_element_type=jnp.float32)
        return acc

    # ---- conv1 -> ReLU (cast to bf16 once for conv2's MXU feed) -------------
    h1 = jnp.maximum(conv3x3(x3, Cin, w1_ref, c1_im2col) + b1_ref[...], 0.0)
    h1b = h1.astype(jnp.bfloat16).reshape(H, W, Cout)

    # ---- adjust (1x1 conv) + (b2 + ba) folded in, conv2, residual ReLU ------
    adj = jnp.dot(x_flat, wa_ref[...], preferred_element_type=jnp.float32)
    c2 = conv3x3(h1b, Cout, w2_ref, c2_im2col)
    o_ref[0] = jnp.maximum(c2 + adj + bsum_ref[...], 0.0).astype(o_ref.dtype)


def _padded_vmem_bytes(shape, itemsize):
    """VMEM bytes for `shape`, including (sublane, 128-lane) layout padding."""
    sub = {4: 8, 2: 16, 1: 32}.get(itemsize, 8)
    if len(shape) == 1:
        rows, cols, lead = 1, shape[0], 1
    else:
        rows, cols = shape[-2], shape[-1]
        lead = 1
        for d in shape[:-2]:
            lead *= d
    return lead * _ceil_div(rows, sub) * sub * _ceil_div(cols, 128) * 128 * itemsize


def _single_buffered_spec(shape, index_map):
    """BlockSpec for grid-constant operands; single-buffered when supported."""
    buffered = getattr(pl, "Buffered", None)
    if buffered is not None:
        try:
            return pl.BlockSpec(shape, index_map, pipeline_mode=buffered(1))
        except Exception:
            pass
    return pl.BlockSpec(shape, index_map)


def unet_encode_res_block_nhwc(x_nhwc, params, maxpool=False,
                               out_dtype=jnp.float32):
    """NHWC entry point (preferred: no layout transposes).

    params in PyTorch layouts: w1 (Cout,Cin,3,3), b1 (Cout,), w2 (Cout,Cout,3,3),
    b2 (Cout,), wa (Cout,Cin,1,1), ba (Cout,).  Returns (B, H', W', Cout) NHWC.
    Set out_dtype=jnp.bfloat16 if the next block consumes bf16 (halves writeback).
    """
    w1, b1, w2, b2, wa, ba = params
    Cout, Cin = w1.shape[0], w1.shape[1]

    # bf16 activations: halves input DMA; MXU consumes bf16 anyway (f32 accum).
    x = x_nhwc.astype(jnp.bfloat16)
    B, H0, W0, _ = x.shape

    if maxpool:
        He, We = _ceil_div(H0, 2) * 2, _ceil_div(W0, 2) * 2
        if (He, We) != (H0, W0):        # ceil_mode: pad to even with -inf
            x = jnp.pad(x, ((0, 0), (0, He - H0), (0, We - W0), (0, 0)),
                        constant_values=-jnp.inf)
        H, W = He // 2, We // 2
        # Free, contiguous regroup: (B, 2H, 2W, C) -> (B, H, 2, W, 2C).
        x_in = x.reshape(B, H, 2, W, 2 * Cin)
        x_spec = pl.BlockSpec((1, H, 2, W, 2 * Cin), lambda b: (b, 0, 0, 0, 0))
    else:
        H, W = H0, W0
        x_in = x
        x_spec = pl.BlockSpec((1, H, W, Cin), lambda b: (b, 0, 0, 0))

    HW = H * W

    # K-fusion strategy: full im2col (one dot, K = 9C) for small channel
    # counts; otherwise 3 fused dots with K = 3C (one per kernel row).
    c1_im2col = 9 * Cin <= 256
    c2_im2col = 9 * Cout <= 256

    # Weight repack (bf16), K-major matching the in-kernel lane-concat order:
    # K index = kh*3*C + kw*C + c   (kh outermost for im2col, per-row for 3-dot).
    wt1 = jnp.transpose(w1, (2, 3, 1, 0)).astype(jnp.bfloat16)   # (3,3,Cin,Cout)
    wt2 = jnp.transpose(w2, (2, 3, 1, 0)).astype(jnp.bfloat16)   # (3,3,Cout,Cout)
    if c1_im2col:
        w1p = wt1.reshape(9 * Cin, Cout)
        w1_spec = _single_buffered_spec((9 * Cin, Cout), lambda b: (0, 0))
    else:
        w1p = wt1.reshape(3, 3 * Cin, Cout)
        w1_spec = _single_buffered_spec((3, 3 * Cin, Cout), lambda b: (0, 0, 0))
    if c2_im2col:
        w2p = wt2.reshape(9 * Cout, Cout)
        w2_spec = _single_buffered_spec((9 * Cout, Cout), lambda b: (0, 0))
    else:
        w2p = wt2.reshape(3, 3 * Cout, Cout)
        w2_spec = _single_buffered_spec((3, 3 * Cout, Cout), lambda b: (0, 0, 0))
    wap = jnp.transpose(wa[:, :, 0, 0], (1, 0)).astype(jnp.bfloat16)  # (Cin,Cout)
    b1r = b1.reshape(1, Cout).astype(jnp.float32)
    bsum = (b2 + ba).reshape(1, Cout).astype(jnp.float32)   # conv2 + adjust bias

    kernel = functools.partial(_res_block_kernel, H=H, W=W, Cin=Cin, Cout=Cout,
                               pool=maxpool, c1_im2col=c1_im2col,
                               c2_im2col=c2_im2col)

    # VMEM budget with (sublane,128) layout padding: double-buffered I/O
    # blocks, single-buffered weights, and the in-kernel temporaries; capped
    # at the detected per-core VMEM minus headroom (generation-aware).
    out_isz = jnp.dtype(out_dtype).itemsize
    in_blk = _padded_vmem_bytes(x_in.shape[1:], 2)
    out_blk = _padded_vmem_bytes((HW, Cout), out_isz)
    w_bytes = (_padded_vmem_bytes(w1p.shape, 2) + _padded_vmem_bytes(w2p.shape, 2)
               + _padded_vmem_bytes(wap.shape, 2)
               + 2 * _padded_vmem_bytes((1, Cout), 4))
    tmp = (4 * _padded_vmem_bytes((HW, 3 * Cin), 2)
           + (_padded_vmem_bytes((HW, 9 * Cin), 2) if c1_im2col else 0)
           + 4 * _padded_vmem_bytes((HW, 3 * Cout), 2)
           + (_padded_vmem_bytes((HW, 9 * Cout), 2) if c2_im2col else 0)
           + 4 * _padded_vmem_bytes((HW, Cout), 4)
           + _padded_vmem_bytes((HW, Cout), 2))
    est = 2 * in_blk + 2 * out_blk + w_bytes + tmp
    try:
        cap = int(pltpu.get_tpu_info().vmem_capacity_bytes)
    except Exception:
        cap = 64 * 2 ** 20            # conservative floor (v7x per-TC VMEM)
    vmem_limit = int(min(max(cap - 16 * 2 ** 20, 32 * 2 ** 20),
                         max(32 * 2 ** 20, 2 * est)))

    out = pl.pallas_call(
        kernel,
        out_shape=jax.ShapeDtypeStruct((B, HW, Cout), out_dtype),
        grid_spec=pltpu.PrefetchScalarGridSpec(
            num_scalar_prefetch=0,
            grid=(B,),
            in_specs=[
                x_spec,
                w1_spec,
                _single_buffered_spec((1, Cout), lambda b: (0, 0)),
                w2_spec,
                _single_buffered_spec((1, Cout), lambda b: (0, 0)),
                _single_buffered_spec((Cin, Cout), lambda b: (0, 0)),
            ],
            out_specs=pl.BlockSpec((1, HW, Cout), lambda b: (b, 0, 0)),
        ),
        compiler_params=pltpu.CompilerParams(
            dimension_semantics=("parallel",),
            vmem_limit_bytes=vmem_limit),
    )(x_in, w1p, b1r, w2p, bsum, wap)

    return out.reshape(B, H, W, Cout)


@functools.partial(jax.jit, static_argnames=("maxpool",))
def unet_encode_res_block(x_nchw, params, maxpool=False):
    """Torch-layout (NCHW) compatibility wrapper.  In a full NHWC UNet, call
    unet_encode_res_block_nhwc directly and skip these boundary transposes."""
    x = jnp.transpose(x_nchw, (0, 2, 3, 1))
    y = unet_encode_res_block_nhwc(x, params, maxpool=maxpool)
    return jnp.transpose(y, (0, 3, 1, 2))


def ref_forward(x_nchw, params, maxpool=False):
    """Pure-JAX f32 reference (NCHW, lax.conv) mirroring the PyTorch module."""
    w1, b1, w2, b2, wa, ba = params
    x = x_nchw.astype(jnp.float32)
    if maxpool:
        B, C, H, W = x.shape
        He, We = _ceil_div(H, 2) * 2, _ceil_div(W, 2) * 2
        x = jnp.pad(x, ((0, 0), (0, 0), (0, He - H), (0, We - W)),
                    constant_values=-jnp.inf)
        x = x.reshape(B, C, He // 2, 2, We // 2, 2).max(axis=(3, 5))

    def conv(inp, w, b, pad):
        y = jax.lax.conv_general_dilated(
            inp, w, window_strides=(1, 1),
            padding=[(pad, pad), (pad, pad)],
            dimension_numbers=("NCHW", "OIHW", "NCHW"))
        return y + b[None, :, None, None]

    c = conv(x, w1, b1, 1)
    c = jnp.maximum(c, 0.0)
    c = conv(c, w2, b2, 1)
    a = conv(x, wa, ba, 0)
    return jnp.maximum(c + a, 0.0)


if __name__ == "__main__":
    key = jax.random.PRNGKey(0)

    def make_params(rng, Cin, Cout):
        ks = jax.random.split(rng, 6)
        w1 = 0.1 * jax.random.normal(ks[0], (Cout, Cin, 3, 3), jnp.float32)
        b1 = 0.1 * jax.random.normal(ks[1], (Cout,), jnp.float32)
        w2 = 0.1 * jax.random.normal(ks[2], (Cout, Cout, 3, 3), jnp.float32)
        b2 = 0.1 * jax.random.normal(ks[3], (Cout,), jnp.float32)
        wa = 0.1 * jax.random.normal(ks[4], (Cout, Cin, 1, 1), jnp.float32)
        ba = 0.1 * jax.random.normal(ks[5], (Cout,), jnp.float32)
        return (w1, b1, w2, b2, wa, ba)

    # First config exercises the im2col path (9*C <= 256); second exercises the
    # fused 3-dot path for both convs plus the ceil_mode -inf padding (odd H/W).
    configs = [
        (2, 4, 8, 16, 16),
        (1, 32, 64, 7, 7),
    ]
    for idx, (B, Cin, Cout, H, W) in enumerate(configs):
        kx, kp, key = jax.random.split(key, 3)
        x = jax.random.normal(kx, (B, Cin, H, W), jnp.float32)
        params = make_params(kp, Cin, Cout)
        for mp in (True, False):
            out = jax.block_until_ready(
                unet_encode_res_block(x, params, maxpool=mp))
            ref = ref_forward(x, params, maxpool=mp)
            assert out.shape == ref.shape, (idx, mp, out.shape, ref.shape)
            # bf16 activations/weights with f32 accumulation vs an f32 ref:
            # tolerance scaled by the output magnitude.
            max_err = float(jnp.max(jnp.abs(out - ref)))
            tol = 2e-2 + 2e-2 * float(jnp.max(jnp.abs(ref)))
            assert max_err <= tol, (idx, mp, max_err, tol)

    print("KERNEL_OK")
</pallas_src>

<mosaic_0001>
module attributes {stable_mosaic.version = 11 : i64} {
  func.func @_res_block_kernel(%arg0: i32, %arg1: memref<1x8x2x8x8xbf16, #tpu.memory_space<vmem>>, %arg2: memref<36x8xbf16, #tpu.memory_space<vmem>>, %arg3: memref<1x8xf32, #tpu.memory_space<vmem>>, %arg4: memref<72x8xbf16, #tpu.memory_space<vmem>>, %arg5: memref<1x8xf32, #tpu.memory_space<vmem>>, %arg6: memref<4x8xbf16, #tpu.memory_space<vmem>>, %arg7: memref<1x64x8xf32, #tpu.memory_space<vmem>>) attributes {dimension_semantics = [#tpu.dimension_semantics<parallel>], iteration_bounds = array<i64: 2>, scalar_prefetch = 0 : i64, scratch_operands = 0 : i64, tpu.core_type = #tpu.core_type<tc>, window_params = [{transform_indices = @transform_0, window_bounds = array<i64: 1, 8, 2, 8, 8>}, {pipeline_mode = #tpu.pipeline_mode<synchronous>, transform_indices = @transform_1, window_bounds = array<i64: 36, 8>}, {pipeline_mode = #tpu.pipeline_mode<synchronous>, transform_indices = @transform_2, window_bounds = array<i64: 1, 8>}, {pipeline_mode = #tpu.pipeline_mode<synchronous>, transform_indices = @transform_3, window_bounds = array<i64: 72, 8>}, {pipeline_mode = #tpu.pipeline_mode<synchronous>, transform_indices = @transform_4, window_bounds = array<i64: 1, 8>}, {pipeline_mode = #tpu.pipeline_mode<synchronous>, transform_indices = @transform_5, window_bounds = array<i64: 4, 8>}, {transform_indices = @transform_6, window_bounds = array<i64: 1, 64, 8>}]} {
    %c0 = arith.constant 0 : index
    %c0_0 = arith.constant 0 : index
    %c0_1 = arith.constant 0 : index
    %c0_2 = arith.constant 0 : index
    %c0_3 = arith.constant 0 : index
    %0 = vector.load %arg1[%c0, %c0_0, %c0_1, %c0_2, %c0_3] : memref<1x8x2x8x8xbf16, #tpu.memory_space<vmem>>, vector<1x8x2x8x8xbf16>
    %1 = vector.shape_cast %0 : vector<1x8x2x8x8xbf16> to vector<8x2x8x8xbf16>
    %2 = vector.extract_strided_slice %1 {offsets = [0, 0, 0, 0], sizes = [8, 1, 8, 8], strides = [1, 1, 1, 1]} : vector<8x2x8x8xbf16> to vector<8x1x8x8xbf16>
    %3 = vector.shape_cast %2 : vector<8x1x8x8xbf16> to vector<8x8x8xbf16>
    %4 = vector.extract_strided_slice %1 {offsets = [0, 1, 0, 0], sizes = [8, 1, 8, 8], strides = [1, 1, 1, 1]} : vector<8x2x8x8xbf16> to vector<8x1x8x8xbf16>
    %5 = vector.shape_cast %4 : vector<8x1x8x8xbf16> to vector<8x8x8xbf16>
    %6 = arith.maximumf %3, %5 : vector<8x8x8xbf16>
    %7 = vector.extract_strided_slice %6 {offsets = [0, 0, 0], sizes = [8, 8, 4], strides = [1, 1, 1]} : vector<8x8x8xbf16> to vector<8x8x4xbf16>
    %8 = vector.extract_strided_slice %6 {offsets = [0, 0, 4], sizes = [8, 8, 4], strides = [1, 1, 1]} : vector<8x8x8xbf16> to vector<8x8x4xbf16>
    %9 = arith.maximumf %7, %8 : vector<8x8x4xbf16>
    %10 = vector.shape_cast %9 : vector<8x8x4xbf16> to vector<64x4xbf16>
    %cst = arith.constant 0.000000e+00 : bf16
    %11 = vector.broadcast %cst : bf16 to vector<8x1x4xbf16>
    %12 = vector.extract_strided_slice %9 {offsets = [0, 0, 0], sizes = [8, 7, 4], strides = [1, 1, 1]} : vector<8x8x4xbf16> to vector<8x7x4xbf16>
    %13 = tpu.concatenate %11, %12 in 1 : vector<8x1x4xbf16>, vector<8x7x4xbf16> -> vector<8x8x4xbf16>
    %14 = vector.extract_strided_slice %9 {offsets = [0, 1, 0], sizes = [8, 7, 4], strides = [1, 1, 1]} : vector<8x8x4xbf16> to vector<8x7x4xbf16>
    %15 = tpu.concatenate %14, %11 in 1 : vector<8x7x4xbf16>, vector<8x1x4xbf16> -> vector<8x8x4xbf16>
    %16 = tpu.concatenate %13, %9, %15 in 2 : vector<8x8x4xbf16>, vector<8x8x4xbf16>, vector<8x8x4xbf16> -> vector<8x8x12xbf16>
    %17 = vector.shape_cast %16 : vector<8x8x12xbf16> to vector<64x12xbf16>
    %cst_4 = arith.constant 0.000000e+00 : bf16
    %18 = vector.broadcast %cst_4 : bf16 to vector<8x12xbf16>
    %19 = vector.extract_strided_slice %17 {offsets = [0, 0], sizes = [56, 12], strides = [1, 1]} : vector<64x12xbf16> to vector<56x12xbf16>
    %20 = tpu.concatenate %18, %19 in 0 : vector<8x12xbf16>, vector<56x12xbf16> -> vector<64x12xbf16>
    %cst_5 = arith.constant 0.000000e+00 : bf16
    %21 = vector.broadcast %cst_5 : bf16 to vector<8x12xbf16>
    %22 = vector.extract_strided_slice %17 {offsets = [8, 0], sizes = [56, 12], strides = [1, 1]} : vector<64x12xbf16> to vector<56x12xbf16>
    %23 = tpu.concatenate %22, %21 in 0 : vector<56x12xbf16>, vector<8x12xbf16> -> vector<64x12xbf16>
    %24 = tpu.concatenate %20, %17, %23 in 1 : vector<64x12xbf16>, vector<64x12xbf16>, vector<64x12xbf16> -> vector<64x36xbf16>
    %c0_6 = arith.constant 0 : index
    %c0_7 = arith.constant 0 : index
    %25 = vector.load %arg2[%c0_6, %c0_7] : memref<36x8xbf16, #tpu.memory_space<vmem>>, vector<36x8xbf16>
    %cst_8 = arith.constant dense<0.000000e+00> : vector<64x8xf32>
    %26 = tpu.matmul %24, %25, %cst_8 {dimension_numbers = #tpu.dot_dimension_numbers<[1], [0], [0], [1], [0, 0, 1, 1], [], []>} : vector<64x36xbf16>, vector<36x8xbf16>, vector<64x8xf32> -> vector<64x8xf32>
    %c0_9 = arith.constant 0 : index
    %c0_10 = arith.constant 0 : index
    %27 = vector.load %arg3[%c0_9, %c0_10] : memref<1x8xf32, #tpu.memory_space<vmem>>, vector<1x8xf32>
    %28 = vector.broadcast %27 : vector<1x8xf32> to vector<64x8xf32>
    %29 = arith.addf %26, %28 : vector<64x8xf32>
    %cst_11 = arith.constant 0.000000e+00 : f32
    %30 = vector.broadcast %cst_11 : f32 to vector<64x8xf32>
    %31 = arith.maximumf %29, %30 : vector<64x8xf32>
    %32 = arith.truncf %31 : vector<64x8xf32> to vector<64x8xbf16>
    %33 = vector.shape_cast %32 : vector<64x8xbf16> to vector<8x8x8xbf16>
    %c0_12 = arith.constant 0 : index
    %c0_13 = arith.constant 0 : index
    %34 = vector.load %arg6[%c0_12, %c0_13] : memref<4x8xbf16, #tpu.memory_space<vmem>>, vector<4x8xbf16>
    %cst_14 = arith.constant dense<0.000000e+00> : vector<64x8xf32>
    %35 = tpu.matmul %10, %34, %cst_14 {dimension_numbers = #tpu.dot_dimension_numbers<[1], [0], [0], [1], [0, 0, 1, 1], [], []>} : vector<64x4xbf16>, vector<4x8xbf16>, vector<64x8xf32> -> vector<64x8xf32>
    %cst_15 = arith.constant 0.000000e+00 : bf16
    %36 = vector.broadcast %cst_15 : bf16 to vector<8x1x8xbf16>
    %37 = vector.extract_strided_slice %33 {offsets = [0, 0, 0], sizes = [8, 7, 8], strides = [1, 1, 1]} : vector<8x8x8xbf16> to vector<8x7x8xbf16>
    %38 = tpu.concatenate %36, %37 in 1 : vector<8x1x8xbf16>, vector<8x7x8xbf16> -> vector<8x8x8xbf16>
    %39 = vector.extract_strided_slice %33 {offsets = [0, 1, 0], sizes = [8, 7, 8], strides = [1, 1, 1]} : vector<8x8x8xbf16> to vector<8x7x8xbf16>
    %40 = tpu.concatenate %39, %36 in 1 : vector<8x7x8xbf16>, vector<8x1x8xbf16> -> vector<8x8x8xbf16>
    %41 = tpu.concatenate %38, %33, %40 in 2 : vector<8x8x8xbf16>, vector<8x8x8xbf16>, vector<8x8x8xbf16> -> vector<8x8x24xbf16>
    %42 = vector.shape_cast %41 : vector<8x8x24xbf16> to vector<64x24xbf16>
    %cst_16 = arith.constant 0.000000e+00 : bf16
    %43 = vector.broadcast %cst_16 : bf16 to vector<8x24xbf16>
    %44 = vector.extract_strided_slice %42 {offsets = [0, 0], sizes = [56, 24], strides = [1, 1]} : vector<64x24xbf16> to vector<56x24xbf16>
    %45 = tpu.concatenate %43, %44 in 0 : vector<8x24xbf16>, vector<56x24xbf16> -> vector<64x24xbf16>
    %cst_17 = arith.constant 0.000000e+00 : bf16
    %46 = vector.broadcast %cst_17 : bf16 to vector<8x24xbf16>
    %47 = vector.extract_strided_slice %42 {offsets = [8, 0], sizes = [56, 24], strides = [1, 1]} : vector<64x24xbf16> to vector<56x24xbf16>
    %48 = tpu.concatenate %47, %46 in 0 : vector<56x24xbf16>, vector<8x24xbf16> -> vector<64x24xbf16>
    %49 = tpu.concatenate %45, %42, %48 in 1 : vector<64x24xbf16>, vector<64x24xbf16>, vector<64x24xbf16> -> vector<64x72xbf16>
    %c0_18 = arith.constant 0 : index
    %c0_19 = arith.constant 0 : index
    %50 = vector.load %arg4[%c0_18, %c0_19] : memref<72x8xbf16, #tpu.memory_space<vmem>>, vector<72x8xbf16>
    %cst_20 = arith.constant dense<0.000000e+00> : vector<64x8xf32>
    %51 = tpu.matmul %49, %50, %cst_20 {dimension_numbers = #tpu.dot_dimension_numbers<[1], [0], [0], [1], [0, 0, 1, 1], [], []>} : vector<64x72xbf16>, vector<72x8xbf16>, vector<64x8xf32> -> vector<64x8xf32>
    %52 = arith.addf %51, %35 : vector<64x8xf32>
    %c0_21 = arith.constant 0 : index
    %c0_22 = arith.constant 0 : index
    %53 = vector.load %arg5[%c0_21, %c0_22] : memref<1x8xf32, #tpu.memory_space<vmem>>, vector<1x8xf32>
    %54 = vector.broadcast %53 : vector<1x8xf32> to vector<64x8xf32>
    %55 = arith.addf %52, %54 : vector<64x8xf32>
    %cst_23 = arith.constant 0.000000e+00 : f32
    %56 = vector.broadcast %cst_23 : f32 to vector<64x8xf32>
    %57 = arith.maximumf %55, %56 : vector<64x8xf32>
    %c0_24 = arith.constant 0 : index
    %c0_25 = arith.constant 0 : index
    %c0_26 = arith.constant 0 : index
    %58 = vector.load %arg7[%c0_24, %c0_25, %c0_26] : memref<1x64x8xf32, #tpu.memory_space<vmem>>, vector<1x64x8xf32>
    %59 = vector.shape_cast %58 : vector<1x64x8xf32> to vector<64x8xf32>
    %60 = vector.shape_cast %57 : vector<64x8xf32> to vector<1x64x8xf32>
    tpu.vector_store %arg7[%c0_24, %c0_25, %c0_26], %60 {strides = array<i32>} : memref<1x64x8xf32, #tpu.memory_space<vmem>>, vector<1x64x8xf32>,
    return
  }
  func.func @transform_0(%arg0: i32) -> (i32, i32, i32, i32, i32) {
    %c0_i32 = arith.constant 0 : i32
    %c0_i32_0 = arith.constant 0 : i32
    %c0_i32_1 = arith.constant 0 : i32
    %c0_i32_2 = arith.constant 0 : i32
    %c0_i32_3 = arith.constant 0 : i32
    return %arg0, %c0_i32, %c0_i32_0, %c0_i32_1, %c0_i32_2 : i32, i32, i32, i32, i32
  }
  func.func @transform_1(%arg0: i32) -> (i32, i32) {
    %c0_i32 = arith.constant 0 : i32
    %c0_i32_0 = arith.constant 0 : i32
    %c0_i32_1 = arith.constant 0 : i32
    return %c0_i32, %c0_i32_0 : i32, i32
  }
  func.func @transform_2(%arg0: i32) -> (i32, i32) {
    %c0_i32 = arith.constant 0 : i32
    %c0_i32_0 = arith.constant 0 : i32
    %c0_i32_1 = arith.constant 0 : i32
    return %c0_i32, %c0_i32_0 : i32, i32
  }
  func.func @transform_3(%arg0: i32) -> (i32, i32) {
    %c0_i32 = arith.constant 0 : i32
    %c0_i32_0 = arith.constant 0 : i32
    %c0_i32_1 = arith.constant 0 : i32
    return %c0_i32, %c0_i32_0 : i32, i32
  }
  func.func @transform_4(%arg0: i32) -> (i32, i32) {
    %c0_i32 = arith.constant 0 : i32
    %c0_i32_0 = arith.constant 0 : i32
    %c0_i32_1 = arith.constant 0 : i32
    return %c0_i32, %c0_i32_0 : i32, i32
  }
  func.func @transform_5(%arg0: i32) -> (i32, i32) {
    %c0_i32 = arith.constant 0 : i32
    %c0_i32_0 = arith.constant 0 : i32
    %c0_i32_1 = arith.constant 0 : i32
    return %c0_i32, %c0_i32_0 : i32, i32
  }
  func.func @transform_6(%arg0: i32) -> (i32, i32, i32) {
    %c0_i32 = arith.constant 0 : i32
    %c0_i32_0 = arith.constant 0 : i32
    %c0_i32_1 = arith.constant 0 : i32
    return %arg0, %c0_i32, %c0_i32_0 : i32, i32, i32
  }
}

</mosaic_0001>

<bundles_post_ra>
// kernel: unet_encode_res_block.1
= control target key start
LH: loop header
LB: loop body
LE: loop exit
PB: predicated region body
PF: predicated region fallthrough
CT: control target
= control target key end

     0   :  { %s1389_s21 = smov 0   ;;  %s1773_s0 = inlined_call_operand.vmem [shape: bf16[2,8,2,8,8], index: 0, kind: input, shape index: {}]   ;;  %s1774_s1 = inlined_call_operand.vmem [shape: bf16[36,8], index: 1, kind: input, shape index: {}]   ;;  %s1775_s2 = inlined_call_operand.vmem [shape: f32[1,8], index: 2, kind: input, shape index: {}]   ;;  %s1776_s3 = inlined_call_operand.vmem [shape: bf16[72,8], index: 3, kind: input, shape index: {}]   ;;  %s1777_s4 = inlined_call_operand.vmem [shape: f32[1,8], index: 4, kind: input, shape index: {}]   ;;  %s1778_s5 = inlined_call_operand.vmem [shape: bf16[4,8], index: 5, kind: input, shape index: {}]   ;;  %s1779_s6 = inlined_call_operand.vmem [shape: f32[2,64,8], index: 6, kind: output, shape index: {}]  }
   0x1 LB: > { %s1208_s22 = sadd.s32 4294967295, %s1345_s21   ;;  %p1212_p0 = scmp.ge.s32.totalorder %s1345_s21, 1  ;;  %s1345_s21 = sphi %s1389_s21, %s16_s21  }
   0x2   : > { %p212_p1 = scmp.lt.s32.totalorder %s1345_s21, 3 }
   0x4   : > { %p213_p2 = pnand %p1212_p0, %p212_p1 }
   0x5   : > { %p242_p3 = scmp.lt.s32.totalorder (!%p213_p2), %s1208_s22, 1  ;;  %s1347_s27 = smov (!%p213_p2), 124  }
   0x6   : > { %216 = sbr.rel (%p213_p2) target bundleno = 1063 (0x427), region = 44  ;;  %s1348_s30 = smov (!%p213_p2), 4  }
   0x7   : > { %s1349_s7 = smov (!%p213_p2), 8   ;;  %s1350_s8 = smov (!%p213_p2), 12  }
   0x8   : > { %s1351_s9 = smov (!%p213_p2), 24   ;;  %s1352_s18 = smov (!%p213_p2), 16  }
   0x9   : > { %s1353_s19 = smov (!%p213_p2), 48  }
   0xb   : > { %s1785_s22 = smov (!%p242_p3, %s1208_s22), 1  ;;  %vm675_vm0 = vcmask 1041408   ;;  %v724_v39 = vld [vmem:[%s1778_s5] sm:$0x3]  ;;  %vm531_vm1 = vcmask 31744   ;;  %vm480_vm2 = vcmask 1043456  }
   0xc   : > { %s1255_s23 = sshll.u32 %s1785_s22, 6  ;;  %v742_v40 = vsel %vm675_vm0, %v724_v39, 0  ;;  %vm481_vm3 = vsmask.f32 3328  ;;  %vm445_vm5 = vcmask 1040384   ;;  %vm556_vm8 = vcmask 64512  }
   0xd   : > { %s246_s26 = scalar_lea.vmem %s1773_s0, %s1255_s23  ;;  %751 = vmatpush.bf16.msra.mxu1 %v742_v40  ;;  %vm1419_vm4 = vmand %vm480_vm2, %vm481_vm3  ;;  %vm446_vm6 = vsmask.f32 256  ;;  %vm633_vm9 = vcmask 195584   ;;  %vm621_vm10 = vcmask 97280   ;;  %vm666_vm11 = vcmask 293888   ;;  %s1752_s13 = scalar_lea.vmem %s1779_s6, %s1255_s23 }
   0xe   : > { %v1264_v0 = vld [vmem:[%s246_s26] sm:$0xff]   ;;  %v1295_v1 = vld [vmem:[%s246_s26 + $0x8] sm:$0xff]   ;;  %v1296_v2 = vld [vmem:[%s246_s26 + $0x10] sm:$0xff]   ;;  %vm965_vm12 = vcmask 130048   ;;  %vm1039_vm13 = vcmask 392192   ;;  %vm1084_vm14 = vcmask 588800  }
   0xf   : > { %v1265_v3 = vunpack.c.l.bf16 %v1264_v0  ;;  %v1266_v4 = vunpack.c.h.bf16 %v1264_v0  ;;  %v1269_v5 = vunpack.c.l.bf16 %v1295_v1  ;;  %v1270_v6 = vunpack.c.h.bf16 %v1295_v1  ;;  %v1297_v7 = vld [vmem:[%s246_s26 + $0x18] sm:$0xff]   ;;  %v1298_v8 = vld [vmem:[%s246_s26 + $0x20] sm:$0xff]   ;;  %v1299_v9 = vld [vmem:[%s246_s26 + $0x28] sm:$0xff]  }
  0x10   : > { %v1273_v10 = vunpack.c.l.bf16 %v1296_v2  ;;  %v1274_v11 = vunpack.c.h.bf16 %v1296_v2  ;;  %v1277_v12 = vunpack.c.l.bf16 %v1297_v7  ;;  %v1278_v13 = vunpack.c.h.bf16 %v1297_v7  ;;  %v1300_v14 = vld [vmem:[%s246_s26 + $0x30] sm:$0xff]   ;;  %v1301_v22 = vld [vmem:[%s246_s26 + $0x38] sm:$0xff]   ;;  %vm1490_vm7 = vmand %vm445_vm5, %vm446_vm6 }
  0x11   : > { %v285_v15 = vmax.f32 %v1265_v3, %v1266_v4  ;;  %v286_v16 = vmax.f32 %v1269_v5, %v1270_v6  ;;  %v1281_v17 = vunpack.c.l.bf16 %v1298_v8  ;;  %v1282_v18 = vunpack.c.h.bf16 %v1298_v8 }
  0x12   : > { %v288_v19 = vmax.f32 %v1277_v12, %v1278_v13  ;;  %v1285_v20 = vunpack.c.l.bf16 %v1299_v9  ;;  %v1286_v21 = vunpack.c.h.bf16 %v1299_v9  ;;  %v1289_v24 = vunpack.c.l.bf16 %v1300_v14 }
  0x13   : > { %v289_v23 = vmax.f32 %v1281_v17, %v1282_v18  ;;  %v287_v25 = vmax.f32 %v1273_v10, %v1274_v11  ;;  %v1290_v26 = vunpack.c.h.bf16 %v1300_v14  ;;  %v1293_v28 = vunpack.c.l.bf16 %v1301_v22 }
  0x14   : > { %v1405_v27 = vmax.f32 %v1285_v20, %v1286_v21  ;;  %v1322_v30 = vpack.i.bf16 %v286_v16, %v285_v15  ;;  %v1294_v31 = vunpack.c.h.bf16 %v1301_v22 }
  0x15   : > { %v291_v29 = vmax.f32 %v1289_v24, %v1290_v26  ;;  %v295_v32 = vpack.c.bf16 %v287_v25, %v287_v25  ;;  %v1327_v33 = vpack.i.bf16 %v289_v23, %v288_v19 }
  0x16   : > { %1323 = vrot.lane.b32.xlu0 %v1322_v30, %s1347_s27  ;;  %v292_v34 = vmax.f32 %v1293_v28, %v1294_v31 }
  0x17   : > { %1328 = vrot.lane.b32.xlu1 %v1327_v33, %s1347_s27  ;;  %v303_v36 = vunpack.c.l.bf16 %v295_v32  ;;  %v1332_v38 = vpack.i.bf16 %v291_v29, %v1405_v27 }
  0x18   : > { %v300_v35 = vpack.c.bf16 %v292_v34, %v292_v34 }
  0x1a   : > { %v1407_v37 = vunpack.c.l.bf16 %v300_v35 }
  0x1c   : > { %331 = vrot.lane.b32.xlu2 %v1407_v37, %s1347_s27 }
  0x1e   : > { %321 = vrot.lane.b32.xlu0 %v303_v36, %s1347_s27 }
  0x1f   : > { %1333 = vrot.lane.b32.xlu1 %v1332_v38, %s1347_s27 }
  0x88   : > { %v1324_v41 = vpop.permute.xlu0 %1323 }
  0x89   : > { %v1326_v42 = vunpack.i.h.bf16 %v1324_v41  ;;  %v1325_v43 = vunpack.i.l.bf16 %v1324_v41  ;;  %v1329_v44 = vpop.permute.xlu1 %1328 }
  0x8a   : > { %v1331_v47 = vunpack.i.h.bf16 %v1329_v44  ;;  %v1330_v48 = vunpack.i.l.bf16 %v1329_v44 }
  0x8b   : > { %v342_v45 = vmax.f32 %v286_v16, %v1326_v42  ;;  %v341_v46 = vmax.f32 %v285_v15, %v1325_v43 }
  0x8c   : > { %v344_v51 = vmax.f32 %v288_v19, %v1330_v48  ;;  %v345_v54 = vmax.f32 %v289_v23, %v1331_v47 }
  0x8d   : > { %v350_v49 = vpack.c.bf16 %v342_v45, %v342_v45  ;;  %v349_v50 = vpack.c.bf16 %v341_v46, %v341_v46 }
  0x8e   : > { %v352_v55 = vpack.c.bf16 %v344_v51, %v344_v51  ;;  %v353_v0 = vpack.c.bf16 %v345_v54, %v345_v54 }
  0x8f   : > { %v366_v52 = vunpack.c.l.b16 %v350_v49  ;;  %v365_v53 = vunpack.c.l.b16 %v349_v50  ;;  %v332_v49 = vpop.permute.xlu2 %331 }
  0x90   : > { %v322_v56 = vpop.permute.xlu0 %321  ;;  %v368_v61 = vunpack.c.l.b16 %v352_v55  ;;  %v369_v14 = vunpack.c.l.b16 %v353_v0  ;;  %v348_v55 = vmax.f32 %v1407_v37, %v332_v49 }
  0x91   : > { %v343_v57 = vmax.f32 %v303_v36, %v322_v56  ;;  %v374_v58 = vpack.c.b16 %v366_v52, %v366_v52  ;;  %v725_v59 = vpack.c.b16 %v366_v52, %v365_v53  ;;  %v373_v60 = vpack.c.b16 %v365_v53, %v365_v53  ;;  %v1334_v62 = vpop.permute.xlu1 %1333 }
  0x92   : > { %v1336_v3 = vunpack.i.h.bf16 %v1334_v62  ;;  %v1335_v4 = vunpack.i.l.bf16 %v1334_v62  ;;  %v1423_v12 = vpack.c.b16 %v368_v61, %v368_v61  ;;  %v1438_v26 = vpack.c.b16 %v369_v14, %v369_v14 }
  0x93   : > { %v351_v63 = vpack.c.bf16 %v343_v57, %v343_v57  ;;  %493 = vrot.lane.b32.xlu0 %v374_v58, %s1348_s30  ;;  %1229 = vmatmul.msk.bf16.vlgmr.msra.gmra.mxu1 %vm531_vm1, %v725_v59  ;;  %v392_v1 = vshll.u32 %v374_v58, 16  ;;  %v385_v2 = vshll.u32 %v373_v60, 16  ;;  %v389_v6 = vshrl.u32 %v374_v58, 16 }
  0x94   : > { %491 = vrot.lane.b32.xlu2 %v373_v60, %s1348_s30  ;;  %v382_v9 = vshrl.u32 %v373_v60, 16  ;;  %v347_v11 = vmax.f32 %v291_v29, %v1336_v3  ;;  %v346_v16 = vmax.f32 %v1405_v27, %v1335_v4  ;;  %v406_v23 = vshll.u32 %v1423_v12, 16 }
  0x95   : > { %v367_v5 = vunpack.c.l.b16 %v351_v63  ;;  %v458_v7 = vrot.slane %v392_v1, 1  ;;  %v456_v10 = vrot.slane %v385_v2, 1  ;;  %v413_v30 = vshll.u32 %v1438_v26, 16 }
  0x96   : > { %v355_v18 = vpack.c.bf16 %v347_v11, %v347_v11  ;;  %v354_v24 = vpack.c.bf16 %v346_v16, %v346_v16  ;;  %v384_v28 = vrot.slane %v382_v9, 7  ;;  %v391_v31 = vrot.slane %v389_v6, 7 }
  0x97   : > { %v1425_v13 = vpack.c.b16 %v367_v5, %v367_v5  ;;  %v459_v15 = vor.u32 %v458_v7, %v389_v6  ;;  %v457_v17 = vor.u32 %v456_v10, %v382_v9  ;;  %v403_v32 = vshrl.u32 %v1423_v12, 16 }
  0x98   : > { %v371_v27 = vunpack.c.l.b16 %v355_v18  ;;  %v462_v33 = vrot.slane %v406_v23, 1  ;;  %v370_v34 = vunpack.c.l.b16 %v354_v24  ;;  %v726_v38 = vpack.c.b16 %v368_v61, %v367_v5 }
  0x99   : > { %495 = vrot.lane.b32.xlu1 %v1425_v13, %s1348_s30  ;;  %v484_v19 = vsel %vm1419_vm4, %v459_v15, 0  ;;  %v396_v20 = vshrl.u32 %v1425_v13, 16  ;;  %v399_v21 = vshll.u32 %v1425_v13, 16  ;;  %v483_v22 = vsel %vm1419_vm4, %v457_v17, 0 }
  0x9a   : > { %v1445_v36 = vpack.c.b16 %v371_v27, %v371_v27  ;;  %v410_v39 = vshrl.u32 %v1438_v26, 16  ;;  %v464_v40 = vrot.slane %v413_v30, 1  ;;  %v387_v41 = vor.u32 %v385_v2, %v384_v28 }
  0x9b   : > { %517 = vrot.lane.b32.xlu0 %v484_v19, %s1349_s7  ;;  %v460_v25 = vrot.slane %v399_v21, 1  ;;  %v463_v42 = vor.u32 %v462_v33, %v403_v32  ;;  %v394_v43 = vor.u32 %v392_v1, %v391_v31  ;;  %v1453_v44 = vpack.c.b16 %v370_v34, %v370_v34 }
  0x9c   : > { %515 = vrot.lane.b32.xlu2 %v483_v22, %s1349_s7  ;;  %v427_v45 = vshll.u32 %v1445_v36, 16  ;;  %v465_v46 = vor.u32 %v464_v40, %v410_v39  ;;  %v424_v50 = vshrl.u32 %v1445_v36, 16  ;;  %v356_v58 = vpack.c.bf16 %v348_v55, %v348_v55 }
  0x9d   : > { %v461_v29 = vor.u32 %v460_v25, %v396_v20  ;;  %v420_v47 = vshll.u32 %v1453_v44, 16  ;;  %v486_v48 = vsel %vm1419_vm4, %v463_v42, 0  ;;  %v417_v53 = vshrl.u32 %v1453_v44, 16 }
  0x9e   : > { %v468_v51 = vrot.slane %v427_v45, 1  ;;  %v487_v52 = vsel %vm1419_vm4, %v465_v46, 0  ;;  %v727_v59 = vpack.c.b16 %v370_v34, %v369_v14  ;;  %v372_v62 = vunpack.c.l.b16 %v356_v58 }
  0x9f   : > { %v485_v35 = vsel %vm1419_vm4, %v461_v29, 0  ;;  %v466_v54 = vrot.slane %v420_v47, 1  ;;  %v398_v0 = vrot.slane %v396_v20, 7  ;;  %v405_v1 = vrot.slane %v403_v32, 7 }
  0xa0   : > { %v469_v56 = vor.u32 %v468_v51, %v424_v50  ;;  %v380_v37 = vpack.c.b16 %v372_v62, %v372_v62  ;;  %v728_v63 = vpack.c.b16 %v372_v62, %v371_v27  ;;  %v448_v13 = vsel %vm1490_vm7, 0, %v387_v41 }
  0xa1   : > { %519 = vrot.lane.b32.xlu1 %v485_v35, %s1349_s7  ;;  %v467_v57 = vor.u32 %v466_v54, %v417_v53  ;;  %v401_v2 = vor.u32 %v399_v21, %v398_v0  ;;  %v408_v3 = vor.u32 %v406_v23, %v405_v1  ;;  %v449_v18 = vsel %vm1490_vm7, 0, %v394_v43 }
  0xa2   : > { %v489_v60 = vsel %vm1419_vm4, %v469_v56, 0  ;;  %v431_v4 = vshrl.u32 %v380_v37, 16  ;;  %v434_v6 = vshll.u32 %v380_v37, 16  ;;  %v412_v21 = vrot.slane %v410_v39, 7 }
  0xa3   : > { %499 = vrot.lane.b32.xlu0 %v1438_v26, %s1348_s30  ;;  %1230 = vmatmul.msk.bf16.gmra.mxu1 %vm531_vm1, %v726_v38  ;;  %v488_v61 = vsel %vm1419_vm4, %v467_v57, 0  ;;  %v450_v27 = vsel %vm1490_vm7, 0, %v401_v2  ;;  %v419_v35 = vrot.slane %v417_v53, 7  ;;  %v451_v43 = vsel %vm1490_vm7, 0, %v408_v3 }
  0xa4   : > { %497 = vrot.lane.b32.xlu2 %v1423_v12, %s1348_s30  ;;  %v433_v5 = vrot.slane %v431_v4, 7  ;;  %v415_v28 = vor.u32 %v413_v30, %v412_v21  ;;  %v470_v31 = vrot.slane %v434_v6, 1  ;;  %v426_v49 = vrot.slane %v424_v50, 7 }
  0xa5   : > { %v422_v42 = vor.u32 %v420_v47, %v419_v35 }
  0xa6   : > { %v1488_v7 = vor.u32 %v434_v6, %v433_v5  ;;  %v452_v40 = vsel %vm1490_vm7, 0, %v415_v28  ;;  %v471_v41 = vor.u32 %v470_v31, %v431_v4 }
  0xa7   : > { %v453_v55 = vsel %vm1490_vm7, 0, %v422_v42 }
  0xa9   : > { %521 = vrot.lane.b32.xlu1 %v486_v48, %s1349_s7  ;;  %v490_v48 = vsel %vm1419_vm4, %v471_v41, 0 }
  0xab   : > { %501 = vrot.lane.b32.xlu0 %v1453_v44, %s1348_s30 }
  0xac   : > { %523 = vrot.lane.b32.xlu2 %v487_v52, %s1349_s7 }
  0xb1   : > { %503 = vrot.lane.b32.xlu1 %v1445_v36, %s1348_s30 }
  0xb3   : > { %527 = vrot.lane.b32.xlu0 %v489_v60, %s1349_s7  ;;  %1231 = vmatmul.msk.bf16.gmra.mxu1 %vm531_vm1, %v727_v59  ;;  %v429_v60 = vor.u32 %v427_v45, %v426_v49  ;;  %v646_v45 = vld [vmem:[%s1774_s1 + $0x10] sm:$0x3] }
  0xb4   : > { %525 = vrot.lane.b32.xlu2 %v488_v61, %s1349_s7  ;;  %v660_v4 = vunpack.c.l.b16 %v646_v45 }
  0xb6   : > { %v663_v5 = vpack.c.b16 %v660_v4, %v660_v4 }
  0xb8   : > { %v677_v6 = vsel %vm675_vm0, %v663_v5, 0 }
  0xb9   : > { %684 = vmatpush.bf16.msra.mxu0 %v677_v6 }
  0xbb   : > { %505 = vrot.lane.b32.xlu0 %v380_v37, %s1348_s30  ;;  %v454_v37 = vsel %vm1490_vm7, 0, %v429_v60 }
  0xc3   : > { %1232 = vmatmul.msk.bf16.gmra.mxu1 %vm531_vm1, %v728_v63 }
  0xee   : > { %v492_v9 = vpop.permute.xlu2 %491 }
  0xef   : > { %v534_v15 = vsel %vm531_vm1, %v448_v13, %v492_v9  ;;  %v1258_v9 = vld [vmem:[%s1774_s1 + $0x8] sm:$0xff] }
  0xf0   : > { %685 = vmatpush.bf16.msra.mxu0 %v1258_v9 }
  0xf6   : > { %v516_v10 = vpop.permute.xlu2 %515 }
  0xf7   : > { %v558_v17 = vsel %vm556_vm8, %v534_v15, %v516_v10  ;;  %v1257_v10 = vld [vmem:[%s1774_s1] sm:$0xff] }
  0xf8   : > { %v1502_v23 = vunpack.c.l.b16 %v558_v17  ;;  %686 = vmatpush.bf16.msra.mxu0 %v1257_v10 }
  0xfe   : > { %v498_v14 = vpop.permute.xlu2 %497 }
  0xff   : > { %v543_v51 = vsel %vm531_vm1, %v451_v43, %v498_v14 }
 0x105   : > { %v494_v11 = vpop.permute.xlu0 %493 }
 0x106   : > { %v537_v19 = vsel %vm531_vm1, %v449_v18, %v494_v11  ;;  %v524_v29 = vpop.permute.xlu2 %523  ;;  %v587_v11 = vpack.c.b16 %v1502_v23, %v1502_v23 }
 0x108   : > { %v594_v14 = vsel %vm480_vm2, 0, %v587_v11 }
 0x10b   : > { %v496_v16 = vpop.permute.xlu1 %495 }
 0x10c   : > { %v540_v32 = vsel %vm531_vm1, %v450_v27, %v496_v16 }
 0x10d   : > { %v518_v20 = vpop.permute.xlu0 %517 }
 0x10e   : > { %v560_v22 = vsel %vm556_vm8, %v537_v19, %v518_v20  ;;  %v526_v44 = vpop.permute.xlu2 %525  ;;  %v455_v19 = vsel %vm1490_vm7, 0, %v1488_v7 }
 0x10f   : > { %v581_v24 = vunpack.c.l.b16 %v560_v22 }
 0x111   : > { %v600_v25 = vpack.c.b16 %v581_v24, %v1502_v23 }
 0x113   : > { %v520_v33 = vpop.permute.xlu1 %519  ;;  %604 = vrot.lane.b32.xlu1 %v600_v25, %s1350_s8 }
 0x114   : > { %v562_v34 = vsel %vm556_vm8, %v540_v32, %v520_v33 }
 0x115   : > { %v582_v38 = vunpack.c.l.b16 %v562_v34  ;;  %v500_v39 = vpop.permute.xlu0 %499 }
 0x116   : > { %v546_v26 = vsel %vm531_vm1, %v452_v40, %v500_v39 }
 0x117   : > { %v1515_v30 = vpack.c.b16 %v582_v38, %v581_v24  ;;  %v566_v46 = vsel %vm556_vm8, %v546_v26, %v524_v29 }
 0x118   : > { %v584_v47 = vunpack.c.l.b16 %v566_v46 }
 0x119   : > { %613 = vrot.lane.b32.xlu2 %v1515_v30, %s1351_s9 }
 0x11b   : > { %v522_v52 = vpop.permute.xlu1 %521  ;;  %529 = vrot.lane.b32.xlu1 %v490_v48, %s1349_s7 }
 0x11c   : > { %v564_v53 = vsel %vm556_vm8, %v543_v51, %v522_v52 }
 0x11d   : > { %v583_v54 = vunpack.c.l.b16 %v564_v53  ;;  %v502_v56 = vpop.permute.xlu0 %501 }
 0x11e   : > { %v549_v57 = vsel %vm531_vm1, %v453_v55, %v502_v56 }
 0x11f   : > { %v568_v58 = vsel %vm556_vm8, %v549_v57, %v526_v44  ;;  %v601_v59 = vpack.c.b16 %v583_v54, %v582_v38  ;;  %v589_v50 = vpack.c.b16 %v584_v47, %v583_v54  ;;  %v1579_v38 = vld [vmem:[%s1775_s2] ss:$0 sm:$0xff] }
 0x120   : > { %v585_v61 = vunpack.c.l.b16 %v568_v58 }
 0x121   : > { %606 = vrot.lane.b32.xlu2 %v601_v59, %s1350_s8  ;;  %615 = vrot.lane.b32.xlu0 %v589_v50, %s1351_s9 }
 0x122   : > { %v602_v62 = vpack.c.b16 %v585_v61, %v584_v47 }
 0x123   : > { %v504_v63 = vpop.permute.xlu1 %503 }
 0x124   : > { %v552_v0 = vsel %vm531_vm1, %v454_v37, %v504_v63  ;;  %608 = vrot.lane.b32.xlu1 %v602_v62, %s1350_s8 }
 0x125   : > { %v528_v1 = vpop.permute.xlu0 %527 }
 0x126   : > { %v570_v2 = vsel %vm556_vm8, %v552_v0, %v528_v1 }
 0x127   : > { %v586_v3 = vunpack.c.l.b16 %v570_v2 }
 0x129   : > { %v590_v36 = vpack.c.b16 %v586_v3, %v585_v61 }
 0x12b   : > { %617 = vrot.lane.b32.xlu2 %v590_v36, %s1351_s9 }
 0x12d   : > { %v506_v18 = vpop.permute.xlu0 %505 }
 0x12e   : > { %v555_v20 = vsel %vm531_vm1, %v455_v19, %v506_v18 }
 0x173   : > { %v614_v15 = vpop.permute.xlu2 %613 }
 0x17b   : > { %v607_v27 = vpop.permute.xlu2 %606 }
 0x17c   : > { %v626_v31 = vsel %vm621_vm10, %v1515_v30, %v607_v27 }
 0x185   : > { %v605_v13 = vpop.permute.xlu1 %604  ;;  %v618_v34 = vpop.permute.xlu2 %617 }
 0x186   : > { %v623_v16 = vsel %vm621_vm10, %v594_v14, %v605_v13 }
 0x187   : > { %v635_v17 = vsel %vm633_vm9, %v623_v16, %v614_v15 }
 0x188   : > { %1225 = vmatmul.msk.bf16.vlgmr.msra.gmra.mxu0 %vm666_vm11, %v635_v17 }
 0x18d   : > { %v530_v21 = vpop.permute.xlu1 %529 }
 0x18e   : > { %v572_v22 = vsel %vm556_vm8, %v555_v20, %v530_v21 }
 0x18f   : > { %v596_v23 = vunpack.c.l.b16 %v572_v22 }
 0x191   : > { %v603_v24 = vpack.c.b16 %v596_v23, %v586_v3  ;;  %v597_v25 = vpack.c.b16 %v596_v23, %v596_v23 }
 0x193   : > { %610 = vrot.lane.b32.xlu0 %v603_v24, %s1350_s8  ;;  %v599_v28 = vsel %vm480_vm2, %v597_v25, 0  ;;  %v616_v29 = vpop.permute.xlu0 %615 }
 0x194   : > { %619 = vrot.lane.b32.xlu1 %v599_v28, %s1351_s9  ;;  %v637_v7 = vsel %vm633_vm9, %v626_v31, %v616_v29 }
 0x196   : > { %v609_v32 = vpop.permute.xlu1 %608 }
 0x197   : > { %v629_v33 = vsel %vm621_vm10, %v589_v50, %v609_v32 }
 0x198   : > { %1226 = vmatmul.msk.bf16.gmra.mxu0 %vm666_vm11, %v637_v7  ;;  %v639_v35 = vsel %vm633_vm9, %v629_v33, %v618_v34 }
 0x1a8   : > { %1227 = vmatmul.msk.bf16.gmra.mxu0 %vm666_vm11, %v639_v35 }
 0x205   : > { %v611_v39 = vpop.permute.xlu0 %610  ;;  %v688_v40 = vpop.f32.mrf.mxu0 }
 0x206   : > { %v632_v41 = vsel %vm621_vm10, %v590_v36, %v611_v39  ;;  %v689_v26 = vadd.f32 %v1579_v38, %v688_v40  ;;  %v620_v30 = vpop.permute.xlu1 %619 }
 0x207   : > { %v641_v42 = vsel %vm633_vm9, %v632_v41, %v620_v30 }
 0x208   : > { %v708_v43 = vmax.f32 %v689_v26, 0.0  ;;  %1228 = vmatmul.msk.bf16.gmra.mxu0 %vm666_vm11, %v641_v42 }
 0x20a   : > { %v716_v46 = vpack.c.bf16 %v708_v43, %v708_v43 }
 0x20c   : > { %v781_v48 = vunpack.c.l.b16 %v716_v46 }
 0x20d   : > { %v690_v49 = vpop.f32.mrf.mxu0 }
 0x20e   : > { %v1585_v51 = vpack.c.b16 %v781_v48, %v781_v48  ;;  %v691_v52 = vadd.f32 %v1579_v38, %v690_v49 }
 0x210   : > { %v709_v53 = vmax.f32 %v691_v52, 0.0  ;;  %v798_v44 = vshrl.u32 %v1585_v51, 16  ;;  %v801_v47 = vshll.u32 %v1585_v51, 16 }
 0x212   : > { %v717_v54 = vpack.c.bf16 %v709_v53, %v709_v53  ;;  %v800_v55 = vrot.slane %v798_v44, 7 }
 0x214   : > { %v782_v56 = vunpack.c.l.b16 %v717_v54  ;;  %v1594_v57 = vor.u32 %v801_v47, %v800_v55 }
 0x215   : > { %v693_v58 = vpop.f32.mrf.mxu0 }
 0x216   : > { %v1596_v59 = vpack.c.b16 %v782_v56, %v782_v56  ;;  %v694_v50 = vadd.f32 %v1579_v38, %v693_v58 }
 0x218   : > { %v710_v60 = vmax.f32 %v694_v50, 0.0  ;;  %v805_v61 = vshrl.u32 %v1596_v59, 16  ;;  %v808_v62 = vshll.u32 %v1596_v59, 16 }
 0x21a   : > { %v718_v37 = vpack.c.bf16 %v710_v60, %v710_v60  ;;  %v807_v63 = vrot.slane %v805_v61, 7  ;;  %v871_v58 = vrot.slane %v808_v62, 1 }
 0x21c   : > { %v783_v0 = vunpack.c.l.b16 %v718_v37  ;;  %v1603_v1 = vor.u32 %v808_v62, %v807_v63  ;;  %v872_v50 = vor.u32 %v871_v58, %v805_v61 }
 0x21d   : > { %v695_v2 = vpop.f32.mrf.mxu0 }
 0x21e   : > { %v791_v3 = vpack.c.b16 %v783_v0, %v783_v0  ;;  %v696_v36 = vadd.f32 %v1579_v38, %v695_v2  ;;  %v894_v60 = vsel %vm1419_vm4, %v872_v50, 0  ;;  %v862_v58 = vsel %vm1490_vm7, 0, %v1603_v1  ;;  %v1262_v1 = vld [vmem:[%s1776_s3 + $0x18] sm:$0xff] }
 0x220   : > { %v815_v45 = vshll.u32 %v791_v3, 16  ;;  %v711_v4 = vmax.f32 %v696_v36, 0.0  ;;  %905 = vrot.lane.b32.xlu2 %v791_v3, %s1349_s7  ;;  %v812_v5 = vshrl.u32 %v791_v3, 16 }
 0x222   : > { %v719_v6 = vpack.c.bf16 %v711_v4, %v711_v4  ;;  %v873_v9 = vrot.slane %v815_v45, 1  ;;  %v814_v10 = vrot.slane %v812_v5, 7 }
 0x224   : > { %v784_v11 = vunpack.c.l.b16 %v719_v6  ;;  %v874_v13 = vor.u32 %v873_v9, %v812_v5  ;;  %v1607_v14 = vor.u32 %v815_v45, %v814_v10 }
 0x225   : > { %v698_v15 = vpop.f32.mrf.mxu0 }
 0x226   : > { %v792_v16 = vpack.c.b16 %v784_v11, %v784_v11  ;;  %v699_v17 = vadd.f32 %v1579_v38, %v698_v15  ;;  %v895_v18 = vsel %vm1419_vm4, %v874_v13, 0 }
 0x228   : > { %v822_v19 = vshll.u32 %v792_v16, 16  ;;  %v712_v20 = vmax.f32 %v699_v17, 0.0  ;;  %907 = vrot.lane.b32.xlu0 %v792_v16, %s1349_s7  ;;  %929 = vrot.lane.b32.xlu2 %v895_v18, %s1352_s18  ;;  %v819_v21 = vshrl.u32 %v792_v16, 16 }
 0x22a   : > { %v720_v22 = vpack.c.bf16 %v712_v20, %v712_v20  ;;  %v875_v23 = vrot.slane %v822_v19, 1  ;;  %v821_v24 = vrot.slane %v819_v21, 7 }
 0x22c   : > { %v785_v25 = vunpack.c.l.b16 %v720_v22  ;;  %v876_v27 = vor.u32 %v875_v23, %v819_v21  ;;  %v1614_v28 = vor.u32 %v822_v19, %v821_v24 }
 0x22d   : > { %v700_v29 = vpop.f32.mrf.mxu0 }
 0x22e   : > { %v793_v31 = vpack.c.b16 %v785_v25, %v785_v25  ;;  %v701_v7 = vadd.f32 %v1579_v38, %v700_v29  ;;  %v896_v32 = vsel %vm1419_vm4, %v876_v27, 0  ;;  %v863_v27 = vsel %vm1490_vm7, 0, %v1607_v14 }
 0x230   : > { %v829_v33 = vshll.u32 %v793_v31, 16  ;;  %v713_v34 = vmax.f32 %v701_v7, 0.0  ;;  %909 = vrot.lane.b32.xlu1 %v793_v31, %s1349_s7  ;;  %931 = vrot.lane.b32.xlu0 %v896_v32, %s1352_s18  ;;  %v826_v35 = vshrl.u32 %v793_v31, 16 }
 0x232   : > { %v721_v39 = vpack.c.bf16 %v713_v34, %v713_v34  ;;  %v877_v40 = vrot.slane %v829_v33, 1  ;;  %v828_v41 = vrot.slane %v826_v35, 7 }
 0x234   : > { %v786_v26 = vunpack.c.l.b16 %v721_v39  ;;  %v878_v30 = vor.u32 %v877_v40, %v826_v35  ;;  %v1621_v42 = vor.u32 %v829_v33, %v828_v41 }
 0x236   : > { %v794_v43 = vpack.c.b16 %v786_v26, %v786_v26  ;;  %v897_v46 = vsel %vm1419_vm4, %v878_v30, 0 }
 0x238   : > { %v836_v48 = vshll.u32 %v794_v43, 16  ;;  %933 = vrot.lane.b32.xlu1 %v897_v46, %s1352_s18  ;;  %911 = vrot.lane.b32.xlu2 %v794_v43, %s1349_s7  ;;  %v833_v49 = vshrl.u32 %v794_v43, 16 }
 0x23a   : > { %v835_v52 = vrot.slane %v833_v49, 7  ;;  %v879_v53 = vrot.slane %v836_v48, 1 }
 0x23c   : > { %v880_v54 = vor.u32 %v879_v53, %v833_v49  ;;  %v1627_v55 = vor.u32 %v836_v48, %v835_v52 }
 0x23e   : > { %v898_v56 = vsel %vm1419_vm4, %v880_v54, 0  ;;  %v866_v8 = vsel %vm1490_vm7, 0, %v1627_v55 }
 0x240   : > { %935 = vrot.lane.b32.xlu1 %v898_v56, %s1352_s18 }
 0x248   : > { %903 = vrot.lane.b32.xlu1 %v1596_v59, %s1349_s7 }
 0x250   : > { %927 = vrot.lane.b32.xlu1 %v894_v60, %s1352_s18 }
 0x27a   : > { %v906_v10 = vpop.permute.xlu2 %905 }
 0x27b   : > { %v949_v29 = vsel %vm556_vm8, %v863_v27, %v906_v10 }
 0x282   : > { %v930_v24 = vpop.permute.xlu2 %929 }
 0x285   : > { %v703_v37 = vpop.f32.mrf.mxu0 }
 0x286   : > { %v704_v63 = vadd.f32 %v1579_v38, %v703_v37 }
 0x288   : > { %v714_v0 = vmax.f32 %v704_v63, 0.0 }
 0x28a   : > { %v722_v2 = vpack.c.bf16 %v714_v0, %v714_v0  ;;  %v1056_v0 = vld [vmem:[%s1776_s3 + $0x20] sm:$0xf] }
 0x28c   : > { %v787_v3 = vunpack.c.l.b16 %v722_v2  ;;  %v1074_v2 = vunpack.c.l.b16 %v1056_v0 }
 0x28d   : > { %v705_v36 = vpop.f32.mrf.mxu0 }
 0x28e   : > { %v795_v45 = vpack.c.b16 %v787_v3, %v787_v3  ;;  %v706_v62 = vadd.f32 %v1579_v38, %v705_v36  ;;  %v869_v38 = vrot.slane %v801_v47, 1  ;;  %v1079_v3 = vpack.c.b16 %v1074_v2, %v1074_v2 }
 0x290   : > { %v843_v4 = vshll.u32 %v795_v45, 16  ;;  %v715_v5 = vmax.f32 %v706_v62, 0.0  ;;  %913 = vrot.lane.b32.xlu0 %v795_v45, %s1349_s7  ;;  %v840_v59 = vshrl.u32 %v795_v45, 16  ;;  %v870_v22 = vor.u32 %v869_v38, %v798_v44  ;;  %v1261_v62 = vld [vmem:[%s1776_s3 + $0x10] sm:$0xff] }
 0x291   : > { %v864_v44 = vsel %vm1490_vm7, 0, %v1614_v28  ;;  %v865_v28 = vsel %vm1490_vm7, 0, %v1621_v42  ;;  %v1094_v36 = vsel %vm480_vm2, %v1079_v3, 0 }
 0x292   : > { %v723_v61 = vpack.c.bf16 %v715_v5, %v715_v5  ;;  %v842_v6 = vrot.slane %v840_v59, 7  ;;  %v881_v9 = vrot.slane %v843_v4, 1  ;;  %v893_v47 = vsel %vm1419_vm4, %v870_v22, 0  ;;  %v912_v48 = vpop.permute.xlu2 %911  ;;  %1302 = vmatpush.bf16.msra.mxu3 %v1094_v36  ;;  %1099 = vmatpush.bf16.msra.mxu2 %v1094_v36  ;;  %v1260_v5 = vld [vmem:[%s1776_s3 + $0x8] sm:$0xff] }
 0x293   : > { %v958_v49 = vsel %vm556_vm8, %v866_v8, %v912_v48 }
 0x294   : > { %v788_v11 = vunpack.c.l.b16 %v723_v61  ;;  %v882_v13 = vor.u32 %v881_v9, %v840_v59  ;;  %v1642_v15 = vor.u32 %v843_v4, %v842_v6  ;;  %v1259_v61 = vld [vmem:[%s1776_s3] sm:$0xff] }
 0x296   : > { %v796_v16 = vpack.c.b16 %v788_v11, %v788_v11  ;;  %v899_v17 = vsel %vm1419_vm4, %v882_v13, 0  ;;  %1303 = vmatpush.bf16.msra.mxu3 %v1262_v1  ;;  %1100 = vmatpush.bf16.msra.mxu2 %v1262_v1  ;;  %v867_v11 = vsel %vm1490_vm7, 0, %v1642_v15  ;;  %v861_v15 = vsel %vm1490_vm7, 0, %v1594_v57 }
 0x297   : > { %937 = vrot.lane.b32.xlu2 %v899_v17, %s1352_s18 }
 0x298   : > { %901 = vrot.lane.b32.xlu0 %v1585_v51, %s1349_s7  ;;  %v847_v18 = vshrl.u32 %v796_v16, 16  ;;  %v850_v19 = vshll.u32 %v796_v16, 16  ;;  %v971_v51 = vsel %vm965_vm12, %v949_v29, %v930_v24 }
 0x299   : > { %v991_v34 = vunpack.c.l.b16 %v971_v51 }
 0x29a   : > { %v908_v20 = vpop.permute.xlu0 %907  ;;  %v849_v21 = vrot.slane %v847_v18, 7  ;;  %v883_v25 = vrot.slane %v850_v19, 1  ;;  %1304 = vmatpush.bf16.msra.mxu3 %v1261_v62  ;;  %1101 = vmatpush.bf16.msra.mxu2 %v1261_v62 }
 0x29b   : > { %v952_v31 = vsel %vm556_vm8, %v864_v44, %v908_v20 }
 0x29c   : > { %v1653_v23 = vor.u32 %v850_v19, %v849_v21  ;;  %v884_v14 = vor.u32 %v883_v25, %v847_v18 }
 0x29e   : > { %v900_v39 = vsel %vm1419_vm4, %v884_v14, 0  ;;  %v868_v59 = vsel %vm1490_vm7, 0, %v1653_v23  ;;  %1305 = vmatpush.bf16.msra.mxu3 %v1260_v5  ;;  %1102 = vmatpush.bf16.msra.mxu2 %v1260_v5 }
 0x29f   : > { %915 = vrot.lane.b32.xlu2 %v796_v16, %s1349_s7 }
 0x2a0   : > { %925 = vrot.lane.b32.xlu0 %v893_v47, %s1352_s18 }
 0x2a2   : > { %v910_v7 = vpop.permute.xlu1 %909  ;;  %v932_v32 = vpop.permute.xlu0 %931  ;;  %1306 = vmatpush.bf16.msra.mxu3 %v1259_v61  ;;  %1103 = vmatpush.bf16.msra.mxu2 %v1259_v61 }
 0x2a3   : > { %v973_v33 = vsel %vm965_vm12, %v952_v31, %v932_v32  ;;  %v955_v41 = vsel %vm556_vm8, %v865_v28, %v910_v7 }
 0x2a4   : > { %v992_v35 = vunpack.c.l.b16 %v973_v33 }
 0x2a6   : > { %v1008_v40 = vpack.c.b16 %v992_v35, %v991_v34 }
 0x2a7   : > { %939 = vrot.lane.b32.xlu2 %v900_v39, %s1352_s18 }
 0x2a8   : > { %1013 = vrot.lane.b32.xlu0 %v1008_v40, %s1351_s9 }
 0x2aa   : > { %v934_v26 = vpop.permute.xlu1 %933 }
 0x2ab   : > { %v975_v30 = vsel %vm965_vm12, %v955_v41, %v934_v26 }
 0x2ac   : > { %v993_v43 = vunpack.c.l.b16 %v975_v30 }
 0x2ae   : > { %v1678_v46 = vpack.c.b16 %v993_v43, %v992_v35 }
 0x2b0   : > { %1022 = vrot.lane.b32.xlu1 %v1678_v46, %s1353_s19 }
 0x2b2   : > { %v936_v42 = vpop.permute.xlu1 %935 }
 0x2b3   : > { %v977_v52 = vsel %vm965_vm12, %v958_v49, %v936_v42  ;;  %v1338_v49 = vld [vmem:[%s1777_s4] ss:$0 sm:$0xff] }
 0x2b4   : > { %v994_v53 = vunpack.c.l.b16 %v977_v52 }
 0x2b6   : > { %v1009_v54 = vpack.c.b16 %v994_v53, %v993_v43  ;;  %v753_v43 = vpop.f32.mrf.mxu1 }
 0x2b8   : > { %1015 = vrot.lane.b32.xlu2 %v1009_v54, %s1351_s9 }
 0x2ba   : > { %v904_v56 = vpop.permute.xlu1 %903 }
 0x2bb   : > { %v946_v50 = vsel %vm556_vm8, %v862_v58, %v904_v56 }
 0x2be   : > { %v755_v48 = vpop.f32.mrf.mxu1 }
 0x2c2   : > { %v928_v60 = vpop.permute.xlu1 %927 }
 0x2c3   : > { %v969_v37 = vsel %vm965_vm12, %v946_v50, %v928_v60 }
 0x2c4   : > { %v990_v55 = vunpack.c.l.b16 %v969_v37 }
 0x2c6   : > { %v997_v63 = vpack.c.b16 %v991_v34, %v990_v55  ;;  %v758_v8 = vpop.f32.mrf.mxu1 }
 0x2ce   : > { %v760_v56 = vpop.f32.mrf.mxu1 }
 0x2f1   : > { %v938_v45 = vpop.permute.xlu2 %937 }
 0x2f9   : > { %v916_v4 = vpop.permute.xlu2 %915 }
 0x2fa   : > { %v964_v6 = vsel %vm556_vm8, %v868_v59, %v916_v4 }
 0x301   : > { %v940_v9 = vpop.permute.xlu2 %939 }
 0x302   : > { %v981_v10 = vsel %vm965_vm12, %v964_v6, %v940_v9  ;;  %v914_v13 = vpop.permute.xlu0 %913 }
 0x303   : > { %v961_v16 = vsel %vm556_vm8, %v867_v11, %v914_v13  ;;  %v1003_v38 = vunpack.c.l.b16 %v981_v10 }
 0x304   : > { %v979_v17 = vsel %vm965_vm12, %v961_v16, %v938_v45 }
 0x305   : > { %v995_v18 = vunpack.c.l.b16 %v979_v17  ;;  %v1004_v47 = vpack.c.b16 %v1003_v38, %v1003_v38 }
 0x307   : > { %v1010_v19 = vpack.c.b16 %v1003_v38, %v995_v18  ;;  %v999_v20 = vpack.c.b16 %v995_v18, %v994_v53  ;;  %v1006_v51 = vsel %vm480_vm2, %v1004_v47, 0 }
 0x309   : > { %1017 = vrot.lane.b32.xlu2 %v1010_v19, %s1351_s9  ;;  %1024 = vrot.lane.b32.xlu0 %v999_v20, %s1353_s19 }
 0x30a   : > { %v902_v21 = vpop.permute.xlu0 %901 }
 0x30b   : > { %v943_v22 = vsel %vm556_vm8, %v861_v15, %v902_v21 }
 0x311   : > { %1020 = vrot.lane.b32.xlu0 %v997_v63, %s1353_s19 }
 0x312   : > { %v926_v23 = vpop.permute.xlu0 %925  ;;  %v1016_v31 = vpop.permute.xlu2 %1015 }
 0x313   : > { %v967_v24 = vsel %vm965_vm12, %v943_v22, %v926_v23  ;;  %v1035_v7 = vsel %vm633_vm9, %v1678_v46, %v1016_v31 }
 0x314   : > { %v989_v25 = vunpack.c.l.b16 %v967_v24 }
 0x316   : > { %v1007_v27 = vpack.c.b16 %v990_v55, %v989_v25  ;;  %v996_v33 = vpack.c.b16 %v989_v25, %v989_v25  ;;  %v763_v55 = vpop.f32.mrf.mxu1 }
 0x318   : > { %1011 = vrot.lane.b32.xlu1 %v1007_v27, %s1351_s9  ;;  %v1001_v35 = vsel %vm480_vm2, 0, %v996_v33 }
 0x31a   : > { %v1014_v29 = vpop.permute.xlu0 %1013 }
 0x31b   : > { %v1032_v12 = vsel %vm633_vm9, %v997_v63, %v1014_v29 }
 0x31e   : > { %v765_v36 = vpop.f32.mrf.mxu1 }
 0x320   : > { %1026 = vrot.lane.b32.xlu1 %v1006_v51, %s1353_s19 }
 0x322   : > { %v1023_v57 = vpop.permute.xlu1 %1022 }
 0x323   : > { %v1043_v44 = vsel %vm1039_vm13, %v1032_v12, %v1023_v57 }
 0x324   : > { %1250 = vmatmul.msk.bf16.vlgmr.msra.gmra.mxu3 %vm1084_vm14, %v1043_v44 }
 0x326   : > { %v768_v6 = vpop.f32.mrf.mxu1 }
 0x363   : > { %v1018_v41 = vpop.permute.xlu2 %1017 }
 0x364   : > { %v1038_v26 = vsel %vm633_vm9, %v999_v20, %v1018_v41  ;;  %v770_v20 = vpop.f32.mrf.mxu1 }
 0x37b   : > { %v1025_v32 = vpop.permute.xlu0 %1024 }
 0x37c   : > { %v1045_v14 = vsel %vm1039_vm13, %v1035_v7, %v1025_v32 }
 0x37d   : > { %1251 = vmatmul.msk.bf16.gmra.mxu3 %vm1084_vm14, %v1045_v14 }
 0x383   : > { %v1021_v39 = vpop.permute.xlu0 %1020 }
 0x38a   : > { %v1012_v34 = vpop.permute.xlu1 %1011 }
 0x38b   : > { %v1029_v40 = vsel %vm633_vm9, %v1001_v35, %v1012_v34 }
 0x38c   : > { %v1041_v28 = vsel %vm1039_vm13, %v1029_v40, %v1021_v39 }
 0x38d   : > { %1249 = vmatmul.msk.bf16.vlgmr.msra.gmra.mxu2 %vm1084_vm14, %v1041_v28 }
 0x392   : > { %v1027_v30 = vpop.permute.xlu1 %1026 }
 0x393   : > { %v1047_v46 = vsel %vm1039_vm13, %v1038_v26, %v1027_v30 }
 0x394   : > { %1252 = vmatmul.msk.bf16.gmra.mxu3 %vm1084_vm14, %v1047_v46 }
 0x3a7   : > { %v1110_v42 = vpop.f32.mrf.mxu3 }
 0x3a8   : > { %v1111_v52 = vadd.f32 %v1110_v42, %v758_v8 }
 0x3aa   : > { %v1131_v53 = vadd.f32 %v1338_v49, %v1111_v52 }
 0x3ac   : > { %v1139_v54 = vmax.f32 %v1131_v53, 0.0 }
 0x3ae   : > { %1147 = vst.msk [vmem:[%s1752_s13 + $0x10] sm:$0xff] %vm556_vm8, %v1139_v54 }
 0x3af   : > { %v1112_v58 = vpop.f32.mrf.mxu3 }
 0x3b0   : > { %v1113_v50 = vadd.f32 %v1112_v58, %v760_v56 }
 0x3b2   : > { %v1132_v60 = vadd.f32 %v1338_v49, %v1113_v50 }
 0x3b4   : > { %v1140_v37 = vmax.f32 %v1132_v60, 0.0 }
 0x3b6   : > { %1148 = vst.msk [vmem:[%s1752_s13 + $0x18] sm:$0xff] %vm556_vm8, %v1140_v37 }
 0x400   : > { %v1115_v63 = vpop.f32.mrf.mxu3 }
 0x401   : > { %v1116_v0 = vadd.f32 %v1115_v63, %v763_v55 }
 0x403   : > { %v1133_v2 = vadd.f32 %v1338_v49, %v1116_v0 }
 0x405   : > { %v1141_v3 = vmax.f32 %v1133_v2, 0.0 }
 0x407   : > { %1149 = vst.msk [vmem:[%s1752_s13 + $0x20] sm:$0xff] %vm556_vm8, %v1141_v3 }
 0x408   : > { %v1117_v45 = vpop.f32.mrf.mxu3 }
 0x409   : > { %v1118_v1 = vadd.f32 %v1117_v45, %v765_v36 }
 0x40b   : > { %v1134_v62 = vadd.f32 %v1338_v49, %v1118_v1 }
 0x40d   : > { %v1142_v4 = vmax.f32 %v1134_v62, 0.0 }
 0x40f   : > { %1150 = vst.msk [vmem:[%s1752_s13 + $0x28] sm:$0xff] %vm556_vm8, %v1142_v4 }
 0x410   : > { %v1105_v5 = vpop.f32.mrf.mxu2 }
 0x411   : > { %v1106_v59 = vadd.f32 %v1105_v5, %v753_v43 }
 0x413   : > { %v1129_v61 = vadd.f32 %v1338_v49, %v1106_v59 }
 0x415   : > { %v1137_v9 = vmax.f32 %v1129_v61, 0.0 }
 0x417   : > { %1145 = vst.msk [vmem:[%s1752_s13] sm:$0xff] %vm556_vm8, %v1137_v9  ;;  %v1120_v10 = vpop.f32.mrf.mxu3 }
 0x418   : > { %v1121_v11 = vadd.f32 %v1120_v10, %v768_v6  ;;  %v1107_v13 = vpop.f32.mrf.mxu2 }
 0x419   : > { %v1108_v16 = vadd.f32 %v1107_v13, %v755_v48 }
 0x41a   : > { %v1135_v17 = vadd.f32 %v1338_v49, %v1121_v11 }
 0x41b   : > { %v1130_v38 = vadd.f32 %v1338_v49, %v1108_v16 }
 0x41c   : > { %v1143_v18 = vmax.f32 %v1135_v17, 0.0 }
 0x41d   : > { %v1138_v19 = vmax.f32 %v1130_v38, 0.0 }
 0x41e   : > { %1151 = vst.msk [vmem:[%s1752_s13 + $0x30] sm:$0xff] %vm556_vm8, %v1143_v18 }
 0x41f   : > { %1146 = vst.msk [vmem:[%s1752_s13 + $0x8] sm:$0xff] %vm556_vm8, %v1138_v19  ;;  %v1122_v21 = vpop.f32.mrf.mxu3 }
 0x420   : > { %v1123_v15 = vadd.f32 %v1122_v21, %v770_v20 }
 0x422   : > { %v1136_v22 = vadd.f32 %v1338_v49, %v1123_v15 }
 0x424   : > { %v1144_v23 = vmax.f32 %v1136_v22, 0.0 }
 0x426   : > { %1152 = vst.msk [vmem:[%s1752_s13 + $0x38] sm:$0xff] %vm556_vm8, %v1144_v23 }
 0x427 PF: > { %s16_s21 = sadd.s32 1, %s1345_s21  }
 0x428   : > { %p13_p4 = scmp.ge.s32.totalorder %s16_s21, 4  }
 0x42a   :  { %15 = sbr.rel (!%p13_p4) target bundleno = 1 (0x1), region = 74 }

</bundles_post_ra>
